<compile_context>
chip_gen: v7x
topology: tpu7x:2x2x1
jax: 0.10.0
libtpu: 0.0.40
codegen_flags: <defaults>
</compile_context>

<pallas_src>
import numpy as np
import jax
import jax.numpy as jnp
from jax.experimental import pallas as pl
from jax.experimental.pallas import tpu as pltpu

TYPE2ID = {'object': 0, 'segment': 1, 'question': 2}

# VMEM budget for ONE output buffer. Pallas double-buffers the output, and the
# full table block is a few KB, so 2 * budget + table stays comfortably under
# the smallest scoped-VMEM default (v5e: 16 MiB) and far under v7x's 64 MiB.
_OUT_BUFFER_BUDGET_BYTES = 6 * 1024 * 1024
# 512-1024 row slabs already reach ~85% of the HBM-write roofline; bigger tiles
# only shave the ~0.35 us/grid-step overhead while eating VMEM and collapsing
# the grid (bad for v7x's two TensorCores).
_MAX_TILE_ROWS = 1024
# Below this output size the pallas_call launch / pipeline prologue dominates.
_MIN_KERNEL_OUT_BYTES = 1 << 20


def _token_type_kernel(tid_ref, tbl_ref, out_ref):
    # tid_ref : scalar-prefetch (SMEM), shape (1,) int32 — token-type id.
    # tbl_ref : (token_type_num, d_model) — full embedding table in VMEM.
    # out_ref : (tile_s, d_model) — lane-dense output slab.
    tid = tid_ref[0]
    row = tbl_ref[pl.ds(tid, 1), :]                       # (1, d_model) dynamic row select
    out_ref[...] = jnp.broadcast_to(row, out_ref.shape)   # sublane broadcast fill


def token_type_embeddings_forward(embeddings, token_type, embedding_table):
    """embeddings: (bs, seq_length, d_model) — only seq_length is used.
    token_type: one of 'object' | 'segment' | 'question'.
    embedding_table: (token_type_num, d_model).
    Returns (seq_length, d_model), matching the PyTorch module output."""
    seq_length = embeddings.shape[1]
    token_type_num, d_model = embedding_table.shape

    # Host-side string -> id (Python data; no in-kernel equivalent) + bounds check.
    tid = TYPE2ID[token_type]
    if not (0 <= tid < token_type_num):
        raise ValueError(
            f"token_type id {tid} out of range for table with {token_type_num} rows")

    itemsize = jnp.dtype(embedding_table.dtype).itemsize
    out_bytes = seq_length * d_model * itemsize

    # Tiny outputs: skip the kernel; let XLA keep the broadcast implicit/fused.
    if out_bytes < _MIN_KERNEL_OUT_BYTES:
        return jnp.broadcast_to(embedding_table[tid], (seq_length, d_model))

    # Budget-driven seq tiling: multiple of 8 sublanes, lane-dense d_model,
    # ragged last block handled by pl.cdiv + Pallas block clipping.
    bytes_per_row = max(d_model * itemsize, 1)
    max_rows = min(_MAX_TILE_ROWS, _OUT_BUFFER_BUDGET_BYTES // bytes_per_row)
    max_rows = max(8, (max_rows // 8) * 8)
    tile_s = seq_length if seq_length <= max_rows else max_rows
    grid = (pl.cdiv(seq_length, tile_s),)

    token_type_id = jnp.asarray([tid], dtype=jnp.int32)

    # TODO(synk): emit bfloat16 output if downstream consumers tolerate it
    # (~2x HBM-write reduction); kept at the table dtype to preserve semantics.
    out = pl.pallas_call(
        _token_type_kernel,
        out_shape=jax.ShapeDtypeStruct((seq_length, d_model), embedding_table.dtype),
        grid_spec=pltpu.PrefetchScalarGridSpec(
            num_scalar_prefetch=1,
            grid=grid,
            in_specs=[
                # Full-extent table block (token_type_num rows is tiny, a few KB):
                # legal under the (8,128) rule (full-dim extents are allowed) and
                # re-DMA per step is negligible.
                pl.BlockSpec((token_type_num, d_model), lambda s, tid_ref: (0, 0)),
            ],
            out_specs=pl.BlockSpec((tile_s, d_model), lambda s, tid_ref: (s, 0)),
        ),
        compiler_params=pltpu.CompilerParams(
            dimension_semantics=("parallel",),
            vmem_limit_bytes=32 * 1024 * 1024,
        ),
    )(token_type_id, embedding_table)
    return out


def reference_forward(embeddings, token_type, embedding_table):
    seq_length = embeddings.shape[1]
    row = embedding_table[TYPE2ID[token_type]]
    return jnp.broadcast_to(row, (seq_length, embedding_table.shape[1]))


if __name__ == "__main__":
    key = jax.random.PRNGKey(0)
    k_tbl, k1, k2, k3 = jax.random.split(key, 4)

    token_type_num = 3
    # (bs, seq_length, d_model, token_type, key)
    cases = [
        (2, 2048, 256, 'segment', k1),   # kernel path, grid=(2,)
        (2, 1250, 256, 'question', k2),  # kernel path, ragged last block
        (2, 16, 128, 'object', k3),      # tiny -> XLA bypass path
    ]
    d_model_max = max(c[2] for c in cases)
    table_full = jax.random.normal(
        k_tbl, (token_type_num, d_model_max), jnp.float32)

    for bs, seq_length, d_model, token_type, k in cases:
        embeddings = jax.random.normal(k, (bs, seq_length, d_model), jnp.float32)
        embedding_table = table_full[:, :d_model]
        out = token_type_embeddings_forward(embeddings, token_type, embedding_table)
        out = jax.block_until_ready(out)
        ref = reference_forward(embeddings, token_type, embedding_table)
        np.testing.assert_array_equal(np.asarray(out), np.asarray(ref))
        assert out.shape == (seq_length, d_model)

    print("KERNEL_OK")
</pallas_src>

<mosaic_0001>
module attributes {stable_mosaic.version = 11 : i64} {
  func.func @_token_type_kernel(%arg0: i32, %arg1: memref<1xi32, #tpu.memory_space<smem>>, %arg2: memref<3x256xf32, #tpu.memory_space<vmem>>, %arg3: memref<1024x256xf32, #tpu.memory_space<vmem>>) attributes {dimension_semantics = [#tpu.dimension_semantics<parallel>], iteration_bounds = array<i64: 2>, scalar_prefetch = 1 : i64, scratch_operands = 0 : i64, tpu.core_type = #tpu.core_type<tc>, window_params = [{pipeline_mode = #tpu.pipeline_mode<synchronous>, transform_indices = @transform_0, window_bounds = array<i64: 3, 256>}, {transform_indices = @transform_1, window_bounds = array<i64: 1024, 256>}]} {
    %c0 = arith.constant 0 : index
    %0 = memref.load %arg1[%c0] : memref<1xi32, #tpu.memory_space<smem>>
    %1 = arith.index_cast %0 : i32 to index
    %c0_0 = arith.constant 0 : index
    %2 = vector.load %arg2[%1, %c0_0] : memref<3x256xf32, #tpu.memory_space<vmem>>, vector<1x256xf32>
    %3 = vector.shape_cast %2 : vector<1x256xf32> to vector<1x256xf32>
    %4 = vector.broadcast %3 : vector<1x256xf32> to vector<1024x256xf32>
    %c0_1 = arith.constant 0 : index
    %c0_2 = arith.constant 0 : index
    %5 = vector.load %arg3[%c0_1, %c0_2] : memref<1024x256xf32, #tpu.memory_space<vmem>>, vector<1024x256xf32>
    tpu.vector_store %arg3[%c0_1, %c0_2], %4 {strides = array<i32>} : memref<1024x256xf32, #tpu.memory_space<vmem>>, vector<1024x256xf32>,
    return
  }
  func.func @transform_0(%arg0: i32, %arg1: memref<1xi32, #tpu.memory_space<smem>>) -> (i32, i32) {
    %c0_i32 = arith.constant 0 : i32
    %c0_i32_0 = arith.constant 0 : i32
    %c0_i32_1 = arith.constant 0 : i32
    return %c0_i32, %c0_i32_0 : i32, i32
  }
  func.func @transform_1(%arg0: i32, %arg1: memref<1xi32, #tpu.memory_space<smem>>) -> (i32, i32) {
    %c0_i32 = arith.constant 0 : i32
    %c0_i32_0 = arith.constant 0 : i32
    return %arg0, %c0_i32 : i32, i32
  }
}

</mosaic_0001>

<bundles_post_ra>
// kernel: tpu_custom_call.1
= control target key start
LH: loop header
LB: loop body
LE: loop exit
PB: predicated region body
PF: predicated region fallthrough
CT: control target
= control target key end

     0   :  { %s1311_s0 = inlined_call_operand.<no memory space> [shape: s32[1], index: 0, kind: input, shape index: {}]   ;;  %s1312_s1 = inlined_call_operand.hbm [shape: f32[3,256], index: 1, kind: input, shape index: {}]   ;;  %s1313_s2 = inlined_call_operand.hbm [shape: f32[2048,256], index: 2, kind: output, shape index: {}]  }
   0x1   :  { %7 = sst [smem:[#allocation3]] %s1311_s0 }
   0x2   :  { %8 = vsyncpa [#allocation5], 0 }
   0x3   :  { %9 = vsyncpa [#allocation6], 0 }
   0x4   :  { %11 = vsyncpa [#allocation6 + $0x1], 0  ;;  %s655_s11 = smov 0   ;;  %s657_s12 = smov 0  }
   0x5   :  { %s659_s13 = smov 0   ;;  %s661_s14 = smov 0  }
   0x6 LB: > { %s676_s0 = sadd.s32 4294967295, %s631_s14   ;;  %s468_s15 = sadd.s32 4294967294, %s631_s14   ;;  %s631_s14 = sphi %s661_s14, %s1329_s14   ;;  %s627_s13 = sphi %s659_s13, %s1328_s13   ;;  %s623_s12 = sphi %s657_s12, %s1327_s12   ;;  %s619_s11 = sphi %s655_s11, %s1326_s11  }
   0x7   : > { %s680_s16 = sadd.s32 1, %s631_s14   ;;  %s45_s17 = sadd.s32 1, %s627_s13 }
   0x8   : > { %s42_s18 = ssub.s32 %s631_s14, %s680_s16  ;;  %p55_p0 = scmp.ne.s32.totalorder %s627_s13, %s623_s12 }
   0x9   : > { %p43_p1 = scmp.eq.s32.totalorder %s42_s18, 0  ;;  %p56_p2 = scmp.eq.s32.totalorder %s676_s0, 1 }
   0xa   : > { %p61_p3 = scmp.ne.s32.totalorder %s623_s12, %s619_s11  ;;  %p62_p4 = scmp.eq.s32.totalorder %s468_s15, 1 }
   0xb   : > { %s691_s19 = scalar_select %p43_p1, %s627_s13, %s45_s17  }
   0xc   : > { %p693_p5 = por %p56_p2, %p55_p0  ;;  %p697_p6 = por %p62_p4, %p61_p3 }
   0xd   : > { %p469_p7 = scmp.ge.s32.totalorder %s631_s14, 1  ;;  %p69_p8 = scmp.lt.s32.totalorder %s631_s14, 3 }
   0xe   : > { %s1317_s20 = scalar_select %p693_p5, 1, 0 }
   0xf   : > { %s1318_s21 = scalar_select %p697_p6, 1, 0 }
  0x10   : > { %p1314_p9 = scmp.eq.s32.totalorder %s676_s0, 0  ;;  %p704_p10 = pnand %p469_p7, %p69_p8 }
  0x11   : > { %s633_s23 = smov [#allocation4]   ;;  %s537_s28 = scalar_lea.hbm %s1312_s1, 128 }
  0x12   : > { %s1319_s22 = scalar_select %p704_p10, 1, 0 }
  0x13   : > { %s82_s24 = sshll.u32 %s633_s23, 4  ;;  %p491_p11 = pneg %p704_p10  ;;  %s83_s24 = int_to_ptr.vmem [resolvable:$true] %s82_s24 }
  0x14   : > { %p538_p13 = scmp.ne.s32.totalorder %s1312_s1, %s537_s28  ;;  %p544_p3 = scmp.lt.u32.totalorder %s537_s28, %s1312_s1 }
  0x15   : > { %p712_p12 = pnand %p1314_p9, %p491_p11 }
  0x17   : > { %p539_p0 = pneg %p712_p12 }
  0x19   : > { %p540_p1 = pnand %p539_p0, %p538_p13 }
  0x1b   : > { %p541_p2 = pneg %p540_p1 }
  0x1d   : > { %p546_p4 = pnand %p544_p3, %p541_p2 }
  0x1f   : > { %549 = shalt.err (!%p546_p4)
}
  0x20   : > { %s550_s5 = scalar_lea.vmem %s83_s24, 128  ;;  %p558_p9 = scmp.lt.s32.totalorder %s83_s24, %s83_s24 }
  0x21   : > { %p551_p7 = scmp.ne.s32.totalorder %s83_s24, %s550_s5  ;;  %p559_p6 = scmp.lt.s32.totalorder %s550_s5, %s550_s5 }
  0x23   : > { %p553_p8 = pnand %p551_p7, %p539_p0  ;;  %p560_p5 = por %p559_p6, %p558_p9 }
  0x25   : > { %p554_p11 = pneg %p553_p8 }
  0x27   : > { %p561_p10 = pnand %p560_p5, %p554_p11 }
  0x29   : > { %564 = shalt.err (!%p561_p10)
}
  0x2a   : > { %494 = dma.hbm_to_vmem [thread:$0]  (!%p712_p12), %s1312_s1, 128, %s83_s24, [#allocation5]  }
  0x2b   : > { %p1321_p13 = scmp.ne.s32.totalorder %s1319_s22, 0 }
  0x2c   : > { %p1322_p1 = scmp.eq.s32.totalorder (!%p1321_p13), %s676_s0, 0 }
  0x2d   : > { %95 = sbr.rel (%p1321_p13) target bundleno = 208 (0xd0), region = 24 }
  0x34   : > { %610 = dma.done.wait (%p1322_p1), [#allocation5], 128   ;;  %p1323_p0 = pmov %p1322_p1 }
  0x35   : > { %s107_s8 = sand.u32 1, %s623_s12   ;;  %v122_v0 = vlaneseq  ;;  %s111_s9 = sld [smem:[#allocation3]] }
  0x36   : > { %612 = vsyncadd (%p1323_p0), [#allocation5], 4294967168  ;;  %s473_s10 = sshll.u32 %s107_s8, 11  ;;  %s484_s15 = sshll.u32 %s676_s0, 15 }
  0x37   : > { %v123_v1 = vshrl.u32 %v122_v0, 7  ;;  %s742_s23 = scalar_lea.vmem [#allocation7], %s473_s10  ;;  %s748_s28 = scalar_lea.hbm %s1313_s2, %s484_s15 }
  0x38   : > { %s403_s24 = sshll.u32 %s742_s23, 4  ;;  %s1270_s29 = scalar_lea.sflag [#allocation6], %s107_s8  ;;  %s750_s24 = int_to_ptr.vmem [resolvable:$true] %s403_s24 }
  0x39   : > { %v124_v2 = vsub.s32 0, %v123_v1  ;;  %v128_v3 = vsub.s32 1, %v123_v1  ;;  %s565_s30 = scalar_lea.vmem %s750_s24, 32768  ;;  %p1324_p6 = scmp.ne.s32.totalorder %s1317_s20, 0 }
  0x3a   : > { %p566_p5 = scmp.ne.s32.totalorder %s750_s24, %s565_s30  ;;  %s634_s3 = smov [#allocation7]  }
  0x3b   : > { %s112_s17 = sshra.s32 %s111_s9, 2  ;;  %s115_s18 = sand.u32 3, %s111_s9 }
  0x3c   : > { %s482_s22 = sshll.u32 %s112_s17, 3  ;;  %p567_p9 = pnand %p566_p5, %p1324_p6 }
  0x3d   : > { %s118_s25 = sadd.s32 %s482_s22, %s115_s18  ;;  %s569_s4 = sshll.u32 %s634_s3, 4  ;;  %s570_s4 = int_to_ptr.vmem [resolvable:$false] %s569_s4 }
  0x3e   : > { %s119_s0 = scalar_lea.vmem [#allocation4], %s118_s25  ;;  %p568_p10 = pneg %p567_p9 }
  0x3f   : > { %v120_v4 = vld [vmem:[%s119_s0] ss:$4 sm:$0x3]  ;;  %s571_s5 = scalar_lea.vmem %s570_s4, 65536  ;;  %p572_p12 = scmp.lt.s32.totalorder %s750_s24, %s570_s4 }
  0x40   : > { %v752_v5 = vrot.slane %v120_v4, %v124_v2  ;;  %v754_v6 = vrot.slane %v120_v4, %v128_v3  ;;  %p573_p2 = scmp.lt.s32.totalorder %s571_s5, %s565_s30 }
  0x42   : > { %132 = vst [vmem:[%s742_s23] sm:$0xff] %v752_v5  ;;  %134 = vst [vmem:[%s742_s23 + $0x10] sm:$0xff] %v752_v5  ;;  %p574_p3 = por %p573_p2, %p572_p12 }
  0x43   : > { %136 = vst [vmem:[%s742_s23 + $0x20] sm:$0xff] %v752_v5  ;;  %138 = vst [vmem:[%s742_s23 + $0x30] sm:$0xff] %v752_v5 }
  0x44   : > { %140 = vst [vmem:[%s742_s23 + $0x40] sm:$0xff] %v752_v5  ;;  %142 = vst [vmem:[%s742_s23 + $0x50] sm:$0xff] %v752_v5  ;;  %p575_p4 = pnand %p574_p3, %p568_p10 }
  0x45   : > { %144 = vst [vmem:[%s742_s23 + $0x60] sm:$0xff] %v752_v5  ;;  %146 = vst [vmem:[%s742_s23 + $0x70] sm:$0xff] %v752_v5 }
  0x46   : > { %148 = vst [vmem:[%s742_s23 + $0x80] sm:$0xff] %v752_v5  ;;  %150 = vst [vmem:[%s742_s23 + $0x90] sm:$0xff] %v752_v5 }
  0x47   : > { %152 = vst [vmem:[%s742_s23 + $0xa0] sm:$0xff] %v752_v5  ;;  %154 = vst [vmem:[%s742_s23 + $0xb0] sm:$0xff] %v752_v5 }
  0x48   : > { %156 = vst [vmem:[%s742_s23 + $0xc0] sm:$0xff] %v752_v5  ;;  %158 = vst [vmem:[%s742_s23 + $0xd0] sm:$0xff] %v752_v5 }
  0x49   : > { %160 = vst [vmem:[%s742_s23 + $0xe0] sm:$0xff] %v752_v5  ;;  %162 = vst [vmem:[%s742_s23 + $0xf0] sm:$0xff] %v752_v5 }
  0x4a   : > { %164 = vst [vmem:[%s742_s23 + $0x100] sm:$0xff] %v752_v5  ;;  %166 = vst [vmem:[%s742_s23 + $0x110] sm:$0xff] %v752_v5 }
  0x4b   : > { %168 = vst [vmem:[%s742_s23 + $0x120] sm:$0xff] %v752_v5  ;;  %170 = vst [vmem:[%s742_s23 + $0x130] sm:$0xff] %v752_v5 }
  0x4c   : > { %172 = vst [vmem:[%s742_s23 + $0x140] sm:$0xff] %v752_v5  ;;  %174 = vst [vmem:[%s742_s23 + $0x150] sm:$0xff] %v752_v5 }
  0x4d   : > { %176 = vst [vmem:[%s742_s23 + $0x160] sm:$0xff] %v752_v5  ;;  %178 = vst [vmem:[%s742_s23 + $0x170] sm:$0xff] %v752_v5 }
  0x4e   : > { %180 = vst [vmem:[%s742_s23 + $0x180] sm:$0xff] %v752_v5  ;;  %182 = vst [vmem:[%s742_s23 + $0x190] sm:$0xff] %v752_v5 }
  0x4f   : > { %184 = vst [vmem:[%s742_s23 + $0x1a0] sm:$0xff] %v752_v5  ;;  %186 = vst [vmem:[%s742_s23 + $0x1b0] sm:$0xff] %v752_v5 }
  0x50   : > { %188 = vst [vmem:[%s742_s23 + $0x1c0] sm:$0xff] %v752_v5  ;;  %190 = vst [vmem:[%s742_s23 + $0x1d0] sm:$0xff] %v752_v5 }
  0x51   : > { %192 = vst [vmem:[%s742_s23 + $0x1e0] sm:$0xff] %v752_v5  ;;  %194 = vst [vmem:[%s742_s23 + $0x1f0] sm:$0xff] %v752_v5 }
  0x52   : > { %196 = vst [vmem:[%s742_s23 + $0x200] sm:$0xff] %v752_v5  ;;  %198 = vst [vmem:[%s742_s23 + $0x210] sm:$0xff] %v752_v5 }
  0x53   : > { %200 = vst [vmem:[%s742_s23 + $0x220] sm:$0xff] %v752_v5  ;;  %202 = vst [vmem:[%s742_s23 + $0x230] sm:$0xff] %v752_v5 }
  0x54   : > { %204 = vst [vmem:[%s742_s23 + $0x240] sm:$0xff] %v752_v5  ;;  %206 = vst [vmem:[%s742_s23 + $0x250] sm:$0xff] %v752_v5 }
  0x55   : > { %208 = vst [vmem:[%s742_s23 + $0x260] sm:$0xff] %v752_v5  ;;  %210 = vst [vmem:[%s742_s23 + $0x270] sm:$0xff] %v752_v5 }
  0x56   : > { %212 = vst [vmem:[%s742_s23 + $0x280] sm:$0xff] %v752_v5  ;;  %214 = vst [vmem:[%s742_s23 + $0x290] sm:$0xff] %v752_v5 }
  0x57   : > { %216 = vst [vmem:[%s742_s23 + $0x2a0] sm:$0xff] %v752_v5  ;;  %218 = vst [vmem:[%s742_s23 + $0x2b0] sm:$0xff] %v752_v5 }
  0x58   : > { %220 = vst [vmem:[%s742_s23 + $0x2c0] sm:$0xff] %v752_v5  ;;  %222 = vst [vmem:[%s742_s23 + $0x2d0] sm:$0xff] %v752_v5 }
  0x59   : > { %224 = vst [vmem:[%s742_s23 + $0x2e0] sm:$0xff] %v752_v5  ;;  %226 = vst [vmem:[%s742_s23 + $0x2f0] sm:$0xff] %v752_v5 }
  0x5a   : > { %228 = vst [vmem:[%s742_s23 + $0x300] sm:$0xff] %v752_v5  ;;  %230 = vst [vmem:[%s742_s23 + $0x310] sm:$0xff] %v752_v5 }
  0x5b   : > { %232 = vst [vmem:[%s742_s23 + $0x320] sm:$0xff] %v752_v5  ;;  %234 = vst [vmem:[%s742_s23 + $0x330] sm:$0xff] %v752_v5 }
  0x5c   : > { %236 = vst [vmem:[%s742_s23 + $0x340] sm:$0xff] %v752_v5  ;;  %238 = vst [vmem:[%s742_s23 + $0x350] sm:$0xff] %v752_v5 }
  0x5d   : > { %240 = vst [vmem:[%s742_s23 + $0x360] sm:$0xff] %v752_v5  ;;  %242 = vst [vmem:[%s742_s23 + $0x370] sm:$0xff] %v752_v5 }
  0x5e   : > { %244 = vst [vmem:[%s742_s23 + $0x380] sm:$0xff] %v752_v5  ;;  %246 = vst [vmem:[%s742_s23 + $0x390] sm:$0xff] %v752_v5 }
  0x5f   : > { %248 = vst [vmem:[%s742_s23 + $0x3a0] sm:$0xff] %v752_v5  ;;  %250 = vst [vmem:[%s742_s23 + $0x3b0] sm:$0xff] %v752_v5 }
  0x60   : > { %252 = vst [vmem:[%s742_s23 + $0x3c0] sm:$0xff] %v752_v5  ;;  %254 = vst [vmem:[%s742_s23 + $0x3d0] sm:$0xff] %v752_v5 }
  0x61   : > { %256 = vst [vmem:[%s742_s23 + $0x3e0] sm:$0xff] %v752_v5  ;;  %258 = vst [vmem:[%s742_s23 + $0x3f0] sm:$0xff] %v752_v5 }
  0x62   : > { %260 = vst [vmem:[%s742_s23 + $0x400] sm:$0xff] %v752_v5  ;;  %262 = vst [vmem:[%s742_s23 + $0x410] sm:$0xff] %v752_v5 }
  0x63   : > { %264 = vst [vmem:[%s742_s23 + $0x420] sm:$0xff] %v752_v5  ;;  %266 = vst [vmem:[%s742_s23 + $0x430] sm:$0xff] %v752_v5 }
  0x64   : > { %268 = vst [vmem:[%s742_s23 + $0x440] sm:$0xff] %v752_v5  ;;  %270 = vst [vmem:[%s742_s23 + $0x450] sm:$0xff] %v752_v5 }
  0x65   : > { %272 = vst [vmem:[%s742_s23 + $0x460] sm:$0xff] %v752_v5  ;;  %274 = vst [vmem:[%s742_s23 + $0x470] sm:$0xff] %v752_v5 }
  0x66   : > { %276 = vst [vmem:[%s742_s23 + $0x480] sm:$0xff] %v752_v5  ;;  %278 = vst [vmem:[%s742_s23 + $0x490] sm:$0xff] %v752_v5 }
  0x67   : > { %280 = vst [vmem:[%s742_s23 + $0x4a0] sm:$0xff] %v752_v5  ;;  %282 = vst [vmem:[%s742_s23 + $0x4b0] sm:$0xff] %v752_v5 }
  0x68   : > { %284 = vst [vmem:[%s742_s23 + $0x4c0] sm:$0xff] %v752_v5  ;;  %286 = vst [vmem:[%s742_s23 + $0x4d0] sm:$0xff] %v752_v5 }
  0x69   : > { %288 = vst [vmem:[%s742_s23 + $0x4e0] sm:$0xff] %v752_v5  ;;  %290 = vst [vmem:[%s742_s23 + $0x4f0] sm:$0xff] %v752_v5 }
  0x6a   : > { %292 = vst [vmem:[%s742_s23 + $0x500] sm:$0xff] %v752_v5  ;;  %294 = vst [vmem:[%s742_s23 + $0x510] sm:$0xff] %v752_v5 }
  0x6b   : > { %296 = vst [vmem:[%s742_s23 + $0x520] sm:$0xff] %v752_v5  ;;  %298 = vst [vmem:[%s742_s23 + $0x530] sm:$0xff] %v752_v5 }
  0x6c   : > { %300 = vst [vmem:[%s742_s23 + $0x540] sm:$0xff] %v752_v5  ;;  %302 = vst [vmem:[%s742_s23 + $0x550] sm:$0xff] %v752_v5 }
  0x6d   : > { %304 = vst [vmem:[%s742_s23 + $0x560] sm:$0xff] %v752_v5  ;;  %306 = vst [vmem:[%s742_s23 + $0x570] sm:$0xff] %v752_v5 }
  0x6e   : > { %308 = vst [vmem:[%s742_s23 + $0x580] sm:$0xff] %v752_v5  ;;  %310 = vst [vmem:[%s742_s23 + $0x590] sm:$0xff] %v752_v5 }
  0x6f   : > { %312 = vst [vmem:[%s742_s23 + $0x5a0] sm:$0xff] %v752_v5  ;;  %314 = vst [vmem:[%s742_s23 + $0x5b0] sm:$0xff] %v752_v5 }
  0x70   : > { %316 = vst [vmem:[%s742_s23 + $0x5c0] sm:$0xff] %v752_v5  ;;  %318 = vst [vmem:[%s742_s23 + $0x5d0] sm:$0xff] %v752_v5 }
  0x71   : > { %320 = vst [vmem:[%s742_s23 + $0x5e0] sm:$0xff] %v752_v5  ;;  %322 = vst [vmem:[%s742_s23 + $0x5f0] sm:$0xff] %v752_v5 }
  0x72   : > { %324 = vst [vmem:[%s742_s23 + $0x600] sm:$0xff] %v752_v5  ;;  %326 = vst [vmem:[%s742_s23 + $0x610] sm:$0xff] %v752_v5 }
  0x73   : > { %328 = vst [vmem:[%s742_s23 + $0x620] sm:$0xff] %v752_v5  ;;  %330 = vst [vmem:[%s742_s23 + $0x630] sm:$0xff] %v752_v5 }
  0x74   : > { %332 = vst [vmem:[%s742_s23 + $0x640] sm:$0xff] %v752_v5  ;;  %334 = vst [vmem:[%s742_s23 + $0x650] sm:$0xff] %v752_v5 }
  0x75   : > { %336 = vst [vmem:[%s742_s23 + $0x660] sm:$0xff] %v752_v5  ;;  %338 = vst [vmem:[%s742_s23 + $0x670] sm:$0xff] %v752_v5 }
  0x76   : > { %340 = vst [vmem:[%s742_s23 + $0x680] sm:$0xff] %v752_v5  ;;  %342 = vst [vmem:[%s742_s23 + $0x690] sm:$0xff] %v752_v5 }
  0x77   : > { %344 = vst [vmem:[%s742_s23 + $0x6a0] sm:$0xff] %v752_v5  ;;  %346 = vst [vmem:[%s742_s23 + $0x6b0] sm:$0xff] %v752_v5 }
  0x78   : > { %348 = vst [vmem:[%s742_s23 + $0x6c0] sm:$0xff] %v752_v5  ;;  %350 = vst [vmem:[%s742_s23 + $0x6d0] sm:$0xff] %v752_v5 }
  0x79   : > { %352 = vst [vmem:[%s742_s23 + $0x6e0] sm:$0xff] %v752_v5  ;;  %354 = vst [vmem:[%s742_s23 + $0x6f0] sm:$0xff] %v752_v5 }
  0x7a   : > { %356 = vst [vmem:[%s742_s23 + $0x700] sm:$0xff] %v752_v5  ;;  %358 = vst [vmem:[%s742_s23 + $0x710] sm:$0xff] %v752_v5 }
  0x7b   : > { %360 = vst [vmem:[%s742_s23 + $0x720] sm:$0xff] %v752_v5  ;;  %362 = vst [vmem:[%s742_s23 + $0x730] sm:$0xff] %v752_v5 }
  0x7c   : > { %364 = vst [vmem:[%s742_s23 + $0x740] sm:$0xff] %v752_v5  ;;  %366 = vst [vmem:[%s742_s23 + $0x750] sm:$0xff] %v752_v5 }
  0x7d   : > { %368 = vst [vmem:[%s742_s23 + $0x760] sm:$0xff] %v752_v5  ;;  %370 = vst [vmem:[%s742_s23 + $0x770] sm:$0xff] %v752_v5 }
  0x7e   : > { %372 = vst [vmem:[%s742_s23 + $0x780] sm:$0xff] %v752_v5  ;;  %374 = vst [vmem:[%s742_s23 + $0x790] sm:$0xff] %v752_v5 }
  0x7f   : > { %376 = vst [vmem:[%s742_s23 + $0x7a0] sm:$0xff] %v752_v5  ;;  %378 = vst [vmem:[%s742_s23 + $0x7b0] sm:$0xff] %v752_v5 }
  0x80   : > { %380 = vst [vmem:[%s742_s23 + $0x7c0] sm:$0xff] %v752_v5  ;;  %382 = vst [vmem:[%s742_s23 + $0x7d0] sm:$0xff] %v752_v5 }
  0x81   : > { %384 = vst [vmem:[%s742_s23 + $0x7e0] sm:$0xff] %v752_v5  ;;  %386 = vst [vmem:[%s742_s23 + $0x7f0] sm:$0xff] %v752_v5 }
  0x82   : > { %133 = vst [vmem:[%s742_s23 + $0x8] sm:$0xff] %v754_v6  ;;  %135 = vst [vmem:[%s742_s23 + $0x18] sm:$0xff] %v754_v6 }
  0x83   : > { %137 = vst [vmem:[%s742_s23 + $0x28] sm:$0xff] %v754_v6  ;;  %139 = vst [vmem:[%s742_s23 + $0x38] sm:$0xff] %v754_v6 }
  0x84   : > { %141 = vst [vmem:[%s742_s23 + $0x48] sm:$0xff] %v754_v6  ;;  %143 = vst [vmem:[%s742_s23 + $0x58] sm:$0xff] %v754_v6 }
  0x85   : > { %145 = vst [vmem:[%s742_s23 + $0x68] sm:$0xff] %v754_v6  ;;  %147 = vst [vmem:[%s742_s23 + $0x78] sm:$0xff] %v754_v6 }
  0x86   : > { %149 = vst [vmem:[%s742_s23 + $0x88] sm:$0xff] %v754_v6  ;;  %151 = vst [vmem:[%s742_s23 + $0x98] sm:$0xff] %v754_v6 }
  0x87   : > { %153 = vst [vmem:[%s742_s23 + $0xa8] sm:$0xff] %v754_v6  ;;  %155 = vst [vmem:[%s742_s23 + $0xb8] sm:$0xff] %v754_v6 }
  0x88   : > { %157 = vst [vmem:[%s742_s23 + $0xc8] sm:$0xff] %v754_v6  ;;  %159 = vst [vmem:[%s742_s23 + $0xd8] sm:$0xff] %v754_v6 }
  0x89   : > { %161 = vst [vmem:[%s742_s23 + $0xe8] sm:$0xff] %v754_v6  ;;  %163 = vst [vmem:[%s742_s23 + $0xf8] sm:$0xff] %v754_v6 }
  0x8a   : > { %165 = vst [vmem:[%s742_s23 + $0x108] sm:$0xff] %v754_v6  ;;  %167 = vst [vmem:[%s742_s23 + $0x118] sm:$0xff] %v754_v6 }
  0x8b   : > { %169 = vst [vmem:[%s742_s23 + $0x128] sm:$0xff] %v754_v6  ;;  %171 = vst [vmem:[%s742_s23 + $0x138] sm:$0xff] %v754_v6 }
  0x8c   : > { %173 = vst [vmem:[%s742_s23 + $0x148] sm:$0xff] %v754_v6  ;;  %175 = vst [vmem:[%s742_s23 + $0x158] sm:$0xff] %v754_v6 }
  0x8d   : > { %177 = vst [vmem:[%s742_s23 + $0x168] sm:$0xff] %v754_v6  ;;  %179 = vst [vmem:[%s742_s23 + $0x178] sm:$0xff] %v754_v6 }
  0x8e   : > { %181 = vst [vmem:[%s742_s23 + $0x188] sm:$0xff] %v754_v6  ;;  %183 = vst [vmem:[%s742_s23 + $0x198] sm:$0xff] %v754_v6 }
  0x8f   : > { %185 = vst [vmem:[%s742_s23 + $0x1a8] sm:$0xff] %v754_v6  ;;  %187 = vst [vmem:[%s742_s23 + $0x1b8] sm:$0xff] %v754_v6 }
  0x90   : > { %189 = vst [vmem:[%s742_s23 + $0x1c8] sm:$0xff] %v754_v6  ;;  %191 = vst [vmem:[%s742_s23 + $0x1d8] sm:$0xff] %v754_v6 }
  0x91   : > { %193 = vst [vmem:[%s742_s23 + $0x1e8] sm:$0xff] %v754_v6  ;;  %195 = vst [vmem:[%s742_s23 + $0x1f8] sm:$0xff] %v754_v6 }
  0x92   : > { %197 = vst [vmem:[%s742_s23 + $0x208] sm:$0xff] %v754_v6  ;;  %199 = vst [vmem:[%s742_s23 + $0x218] sm:$0xff] %v754_v6 }
  0x93   : > { %201 = vst [vmem:[%s742_s23 + $0x228] sm:$0xff] %v754_v6  ;;  %203 = vst [vmem:[%s742_s23 + $0x238] sm:$0xff] %v754_v6 }
  0x94   : > { %205 = vst [vmem:[%s742_s23 + $0x248] sm:$0xff] %v754_v6  ;;  %207 = vst [vmem:[%s742_s23 + $0x258] sm:$0xff] %v754_v6 }
  0x95   : > { %209 = vst [vmem:[%s742_s23 + $0x268] sm:$0xff] %v754_v6  ;;  %211 = vst [vmem:[%s742_s23 + $0x278] sm:$0xff] %v754_v6 }
  0x96   : > { %213 = vst [vmem:[%s742_s23 + $0x288] sm:$0xff] %v754_v6  ;;  %215 = vst [vmem:[%s742_s23 + $0x298] sm:$0xff] %v754_v6 }
  0x97   : > { %217 = vst [vmem:[%s742_s23 + $0x2a8] sm:$0xff] %v754_v6  ;;  %219 = vst [vmem:[%s742_s23 + $0x2b8] sm:$0xff] %v754_v6 }
  0x98   : > { %221 = vst [vmem:[%s742_s23 + $0x2c8] sm:$0xff] %v754_v6  ;;  %223 = vst [vmem:[%s742_s23 + $0x2d8] sm:$0xff] %v754_v6 }
  0x99   : > { %225 = vst [vmem:[%s742_s23 + $0x2e8] sm:$0xff] %v754_v6  ;;  %227 = vst [vmem:[%s742_s23 + $0x2f8] sm:$0xff] %v754_v6 }
  0x9a   : > { %229 = vst [vmem:[%s742_s23 + $0x308] sm:$0xff] %v754_v6  ;;  %231 = vst [vmem:[%s742_s23 + $0x318] sm:$0xff] %v754_v6 }
  0x9b   : > { %233 = vst [vmem:[%s742_s23 + $0x328] sm:$0xff] %v754_v6  ;;  %235 = vst [vmem:[%s742_s23 + $0x338] sm:$0xff] %v754_v6 }
  0x9c   : > { %237 = vst [vmem:[%s742_s23 + $0x348] sm:$0xff] %v754_v6  ;;  %239 = vst [vmem:[%s742_s23 + $0x358] sm:$0xff] %v754_v6 }
  0x9d   : > { %241 = vst [vmem:[%s742_s23 + $0x368] sm:$0xff] %v754_v6  ;;  %243 = vst [vmem:[%s742_s23 + $0x378] sm:$0xff] %v754_v6 }
  0x9e   : > { %245 = vst [vmem:[%s742_s23 + $0x388] sm:$0xff] %v754_v6  ;;  %247 = vst [vmem:[%s742_s23 + $0x398] sm:$0xff] %v754_v6 }
  0x9f   : > { %249 = vst [vmem:[%s742_s23 + $0x3a8] sm:$0xff] %v754_v6  ;;  %251 = vst [vmem:[%s742_s23 + $0x3b8] sm:$0xff] %v754_v6 }
  0xa0   : > { %253 = vst [vmem:[%s742_s23 + $0x3c8] sm:$0xff] %v754_v6  ;;  %255 = vst [vmem:[%s742_s23 + $0x3d8] sm:$0xff] %v754_v6 }
  0xa1   : > { %257 = vst [vmem:[%s742_s23 + $0x3e8] sm:$0xff] %v754_v6  ;;  %259 = vst [vmem:[%s742_s23 + $0x3f8] sm:$0xff] %v754_v6 }
  0xa2   : > { %261 = vst [vmem:[%s742_s23 + $0x408] sm:$0xff] %v754_v6  ;;  %263 = vst [vmem:[%s742_s23 + $0x418] sm:$0xff] %v754_v6 }
  0xa3   : > { %265 = vst [vmem:[%s742_s23 + $0x428] sm:$0xff] %v754_v6  ;;  %267 = vst [vmem:[%s742_s23 + $0x438] sm:$0xff] %v754_v6 }
  0xa4   : > { %269 = vst [vmem:[%s742_s23 + $0x448] sm:$0xff] %v754_v6  ;;  %271 = vst [vmem:[%s742_s23 + $0x458] sm:$0xff] %v754_v6 }
  0xa5   : > { %273 = vst [vmem:[%s742_s23 + $0x468] sm:$0xff] %v754_v6  ;;  %275 = vst [vmem:[%s742_s23 + $0x478] sm:$0xff] %v754_v6 }
  0xa6   : > { %277 = vst [vmem:[%s742_s23 + $0x488] sm:$0xff] %v754_v6  ;;  %279 = vst [vmem:[%s742_s23 + $0x498] sm:$0xff] %v754_v6 }
  0xa7   : > { %281 = vst [vmem:[%s742_s23 + $0x4a8] sm:$0xff] %v754_v6  ;;  %283 = vst [vmem:[%s742_s23 + $0x4b8] sm:$0xff] %v754_v6 }
  0xa8   : > { %285 = vst [vmem:[%s742_s23 + $0x4c8] sm:$0xff] %v754_v6  ;;  %287 = vst [vmem:[%s742_s23 + $0x4d8] sm:$0xff] %v754_v6 }
  0xa9   : > { %289 = vst [vmem:[%s742_s23 + $0x4e8] sm:$0xff] %v754_v6  ;;  %291 = vst [vmem:[%s742_s23 + $0x4f8] sm:$0xff] %v754_v6 }
  0xaa   : > { %293 = vst [vmem:[%s742_s23 + $0x508] sm:$0xff] %v754_v6  ;;  %295 = vst [vmem:[%s742_s23 + $0x518] sm:$0xff] %v754_v6 }
  0xab   : > { %297 = vst [vmem:[%s742_s23 + $0x528] sm:$0xff] %v754_v6  ;;  %299 = vst [vmem:[%s742_s23 + $0x538] sm:$0xff] %v754_v6 }
  0xac   : > { %301 = vst [vmem:[%s742_s23 + $0x548] sm:$0xff] %v754_v6  ;;  %303 = vst [vmem:[%s742_s23 + $0x558] sm:$0xff] %v754_v6 }
  0xad   : > { %305 = vst [vmem:[%s742_s23 + $0x568] sm:$0xff] %v754_v6  ;;  %307 = vst [vmem:[%s742_s23 + $0x578] sm:$0xff] %v754_v6 }
  0xae   : > { %309 = vst [vmem:[%s742_s23 + $0x588] sm:$0xff] %v754_v6  ;;  %311 = vst [vmem:[%s742_s23 + $0x598] sm:$0xff] %v754_v6 }
  0xaf   : > { %313 = vst [vmem:[%s742_s23 + $0x5a8] sm:$0xff] %v754_v6  ;;  %315 = vst [vmem:[%s742_s23 + $0x5b8] sm:$0xff] %v754_v6 }
  0xb0   : > { %317 = vst [vmem:[%s742_s23 + $0x5c8] sm:$0xff] %v754_v6  ;;  %319 = vst [vmem:[%s742_s23 + $0x5d8] sm:$0xff] %v754_v6 }
  0xb1   : > { %321 = vst [vmem:[%s742_s23 + $0x5e8] sm:$0xff] %v754_v6  ;;  %323 = vst [vmem:[%s742_s23 + $0x5f8] sm:$0xff] %v754_v6 }
  0xb2   : > { %325 = vst [vmem:[%s742_s23 + $0x608] sm:$0xff] %v754_v6  ;;  %327 = vst [vmem:[%s742_s23 + $0x618] sm:$0xff] %v754_v6 }
  0xb3   : > { %329 = vst [vmem:[%s742_s23 + $0x628] sm:$0xff] %v754_v6  ;;  %331 = vst [vmem:[%s742_s23 + $0x638] sm:$0xff] %v754_v6 }
  0xb4   : > { %333 = vst [vmem:[%s742_s23 + $0x648] sm:$0xff] %v754_v6  ;;  %335 = vst [vmem:[%s742_s23 + $0x658] sm:$0xff] %v754_v6 }
  0xb5   : > { %337 = vst [vmem:[%s742_s23 + $0x668] sm:$0xff] %v754_v6  ;;  %339 = vst [vmem:[%s742_s23 + $0x678] sm:$0xff] %v754_v6 }
  0xb6   : > { %341 = vst [vmem:[%s742_s23 + $0x688] sm:$0xff] %v754_v6  ;;  %343 = vst [vmem:[%s742_s23 + $0x698] sm:$0xff] %v754_v6 }
  0xb7   : > { %345 = vst [vmem:[%s742_s23 + $0x6a8] sm:$0xff] %v754_v6  ;;  %347 = vst [vmem:[%s742_s23 + $0x6b8] sm:$0xff] %v754_v6 }
  0xb8   : > { %349 = vst [vmem:[%s742_s23 + $0x6c8] sm:$0xff] %v754_v6  ;;  %351 = vst [vmem:[%s742_s23 + $0x6d8] sm:$0xff] %v754_v6 }
  0xb9   : > { %353 = vst [vmem:[%s742_s23 + $0x6e8] sm:$0xff] %v754_v6  ;;  %355 = vst [vmem:[%s742_s23 + $0x6f8] sm:$0xff] %v754_v6 }
  0xba   : > { %357 = vst [vmem:[%s742_s23 + $0x708] sm:$0xff] %v754_v6  ;;  %359 = vst [vmem:[%s742_s23 + $0x718] sm:$0xff] %v754_v6 }
  0xbb   : > { %361 = vst [vmem:[%s742_s23 + $0x728] sm:$0xff] %v754_v6  ;;  %363 = vst [vmem:[%s742_s23 + $0x738] sm:$0xff] %v754_v6 }
  0xbc   : > { %365 = vst [vmem:[%s742_s23 + $0x748] sm:$0xff] %v754_v6  ;;  %367 = vst [vmem:[%s742_s23 + $0x758] sm:$0xff] %v754_v6 }
  0xbd   : > { %369 = vst [vmem:[%s742_s23 + $0x768] sm:$0xff] %v754_v6  ;;  %371 = vst [vmem:[%s742_s23 + $0x778] sm:$0xff] %v754_v6 }
  0xbe   : > { %373 = vst [vmem:[%s742_s23 + $0x788] sm:$0xff] %v754_v6  ;;  %375 = vst [vmem:[%s742_s23 + $0x798] sm:$0xff] %v754_v6 }
  0xbf   : > { %377 = vst [vmem:[%s742_s23 + $0x7a8] sm:$0xff] %v754_v6  ;;  %379 = vst [vmem:[%s742_s23 + $0x7b8] sm:$0xff] %v754_v6 }
  0xc0   : > { %381 = vst [vmem:[%s742_s23 + $0x7c8] sm:$0xff] %v754_v6  ;;  %383 = vst [vmem:[%s742_s23 + $0x7d8] sm:$0xff] %v754_v6 }
  0xc1   : > { %385 = vst [vmem:[%s742_s23 + $0x7e8] sm:$0xff] %v754_v6  ;;  %387 = vst [vmem:[%s742_s23 + $0x7f8] sm:$0xff] %v754_v6 }
  0xc2   : > { %578 = shalt.err (!%p575_p4)
}
  0xc3   : > { %s579_s6 = scalar_lea.hbm %s748_s28, 32768  ;;  %s583_s9 = scalar_lea.hbm %s1313_s2, 65536 }
  0xc4   : > { %p580_p7 = scmp.ne.s32.totalorder %s748_s28, %s579_s6  ;;  %p584_p13 = scmp.lt.u32.totalorder %s748_s28, %s1313_s2 }
  0xc5   : > { %p585_p1 = scmp.lt.u32.totalorder %s583_s9, %s579_s6  ;;  %p587_p5 = scmp.lt.u32.totalorder %s579_s6, %s748_s28 }
  0xc6   : > { %p581_p8 = pnand %p580_p7, %p1324_p6 }
  0xc7   : > { %p586_p0 = por %p585_p1, %p584_p13 }
  0xc8   : > { %p582_p11 = pneg %p581_p8 }
  0xc9   : > { %p588_p9 = por %p587_p5, %p586_p0 }
  0xcb   : > { %p589_p10 = pnand %p588_p9, %p582_p11 }
  0xcd   : > { %592 = shalt.err (!%p589_p10)
}
  0xce   : > { %s635_s17 = smov 256   ;;  %s636_s18 = smov 16  }
  0xcf   : > { %489 = dma.vmem_to_hbm [thread:$0]  (%p1324_p6), %s750_s24, 32768, %s748_s28, %s1270_s29, %s635_s17, %s635_s17, %s636_s18  }
  0xd0 PF: > { %p501_p12 = scmp.ge.s32.totalorder %s631_s14, 2  ;;  %s418_s22 = sand.u32 1, %s619_s11  }
  0xd1   : > { %p1325_p2 = scmp.ne.s32.totalorder %s1318_s21, 0  ;;  %s419_s23 = scalar_lea.sflag [#allocation6], %s418_s22 }
  0xd3   : > { %p496_p3 = pnand %p501_p12, %p1325_p2 }
  0xd5   : > { %614 = dma.done.wait (!%p496_p3), %s419_s23, 32768  }
  0xd6   : > { %616 = vsyncadd (!%p496_p3), %s419_s23, 4294934528  ;;  %p14_p4 = scmp.ge.s32.totalorder %s680_s16, 4   ;;  %s1326_s11 = smov %s623_s12 }
  0xd7   : > { %s1327_s12 = smov %s627_s13  ;;  %s1328_s13 = smov %s691_s19 }
  0xd8   : > { %s1329_s14 = smov %s680_s16  ;;  %16 = sbr.rel (!%p14_p4) target bundleno = 6 (0x6), region = 62 }
  0xdf   :  { %424 = vsyncpa [#allocation5], 1 }
  0xe0   :  { %426 = vsyncpa [#allocation5 + $0x1], 1 }
  0xe1   :  { %427 = vsyncpa [#allocation6], 1 }
  0xe2   :  { %429 = vsyncpa [#allocation6 + $0x1], 1 }

</bundles_post_ra>
